<compile_context>
chip_gen: v5e
topology: v5e:2x2
jax: 0.10.0
libtpu: 0.0.40
codegen_flags: <defaults>
</compile_context>

<pallas_src>
import jax
import jax.numpy as jnp
from jax.experimental import pallas as pl
from jax.experimental.pallas import tpu as pltpu


_LANES = 512               # lane-dense last dim -> unmasked full-lane stores
_MAX_TILE_ROWS = 2048      # 2048 x 512 f32 block = 4 MiB; double-buffered
                           # in + out = 16 MiB (< 32 MiB scoped VMEM on all gens)
_FAST_PATH_BYTES = 1 << 20 # below ~1 MiB the op is pallas-launch-overhead bound


def _scale_kernel(w_ref, x_ref, o_ref):
    # w_ref: SMEM (1,) scalar; x_ref / o_ref: (tile_r, _LANES) VMEM tiles.
    o_ref[...] = (w_ref[0] * x_ref[...]).astype(o_ref.dtype)


def _pallas_scale_2d(w, x2d, out_dtype):
    """Scalar-broadcast multiply over a lane-dense (rows, _LANES) slab."""
    rows = x2d.shape[0]
    tile_r = min(rows, _MAX_TILE_ROWS)          # full-array block or 4 MiB tiles
    grid = (pl.cdiv(rows, tile_r),)             # ragged last block is masked
    itemsize = jnp.dtype(out_dtype).itemsize

    return pl.pallas_call(
        _scale_kernel,
        out_shape=jax.ShapeDtypeStruct(x2d.shape, out_dtype),
        grid_spec=pl.GridSpec(
            grid=grid,
            in_specs=[
                # 1-element weight lives untiled in SMEM; read as a scalar.
                pl.BlockSpec(memory_space=pltpu.MemorySpace.SMEM),
                # x: row-tiled lane-dense blocks in VMEM.
                pl.BlockSpec((tile_r, _LANES), lambda i: (i, 0)),
            ],
            out_specs=pl.BlockSpec((tile_r, _LANES), lambda i: (i, 0)),
        ),
        cost_estimate=pl.CostEstimate(
            flops=x2d.size,
            bytes_accessed=2 * x2d.size * itemsize,
            transcendentals=0,
        ),
        compiler_params=pltpu.CompilerParams(
            # "parallel" shards the row axis across TensorCores where available
            # and is neutral on single-TC chips.
            # TODO(synk): evaluate pltpu.CORE_PARALLEL on v7x so both TCs share
            # the HBM stream explicitly (skipped here for portability).
            dimension_semantics=("parallel",),
            vmem_limit_bytes=32 * 1024 * 1024,  # v5e scoped default is only 16 MiB
        ),
    )(w, x2d)


def tensor_cuda_forward(w, x, *, force_pallas=False):
    """Pallas implementation of `w.cuda() * x.cuda()` (scalar broadcast mult)."""
    out_dtype = jnp.result_type(w.dtype, x.dtype)
    w = w.reshape(-1)[:1].astype(out_dtype)
    xc = x.astype(out_dtype)
    total = xc.size
    itemsize = jnp.dtype(out_dtype).itemsize

    # Fast path: tiny inputs are pure launch overhead in Pallas; a fused XLA
    # elementwise multiply is strictly faster.
    if not force_pallas and total * itemsize < _FAST_PATH_BYTES:
        return w[0] * xc

    x_flat = xc.reshape(-1)
    aligned = (total // _LANES) * _LANES

    if aligned == total:
        out_flat = _pallas_scale_2d(
            w, x_flat.reshape(-1, _LANES), out_dtype).reshape(-1)
    elif aligned == 0:
        # Fewer than _LANES elements: nothing to tile, just do it in XLA.
        out_flat = w[0] * x_flat
    else:
        # Pallas on the 512-aligned prefix; <=511-element tail via plain XLA.
        # Avoids the full-array pad copy and the post-kernel slice copy.
        head = _pallas_scale_2d(
            w, x_flat[:aligned].reshape(-1, _LANES), out_dtype).reshape(-1)
        tail = w[0] * x_flat[aligned:]
        out_flat = jnp.concatenate([head, tail])

    return out_flat.reshape(x.shape)


if __name__ == "__main__":
    key = jax.random.PRNGKey(0)
    kw, kx, ky = jax.random.split(key, 3)

    # Deterministic stand-in for the torch.randn(1, device='cpu') parameter.
    w = jax.random.normal(kw, (1,), dtype=jnp.float32)
    # Example input implied by the module: NCHW (2, 4, 16, 16) = 2048 elems.
    x = jax.random.normal(kx, (2, 4, 16, 16), dtype=jnp.float32)

    # 1) Default path: small input takes the XLA fast path.
    out_fast = tensor_cuda_forward(w, x)
    # 2) Force the Pallas kernel on the same 512-aligned input (4 x 512 slab).
    out_pallas = tensor_cuda_forward(w, x, force_pallas=True)
    # 3) Exercise the ragged (aligned-prefix + tail) Pallas path.
    x_ragged = jax.random.normal(ky, (3, 5, 7, 11), dtype=jnp.float32)  # 1155 elems
    out_ragged = tensor_cuda_forward(w, x_ragged, force_pallas=True)

    jax.block_until_ready((out_fast, out_pallas, out_ragged))

    ref = w[0] * x
    ref_ragged = w[0] * x_ragged
    assert out_fast.shape == x.shape and out_fast.dtype == x.dtype
    assert out_pallas.shape == x.shape and out_pallas.dtype == x.dtype
    assert out_ragged.shape == x_ragged.shape
    assert jnp.allclose(out_fast, ref, rtol=1e-6, atol=1e-6)
    assert jnp.allclose(out_pallas, ref, rtol=1e-6, atol=1e-6)
    assert jnp.allclose(out_ragged, ref_ragged, rtol=1e-6, atol=1e-6)

    print("KERNEL_OK")
</pallas_src>

<mosaic_0001>
module attributes {stable_mosaic.version = 11 : i64} {
  func.func @_scale_kernel(%arg0: i32, %arg1: memref<1xf32, #tpu.memory_space<smem>>, %arg2: memref<4x512xf32, #tpu.memory_space<vmem>>, %arg3: memref<4x512xf32, #tpu.memory_space<vmem>>) attributes {dimension_semantics = [#tpu.dimension_semantics<parallel>], iteration_bounds = array<i64: 1>, scalar_prefetch = 0 : i64, scratch_operands = 0 : i64, tpu.core_type = #tpu.core_type<tc>, window_params = [{transform_indices = @transform_0, window_bounds = array<i64: 1>}, {transform_indices = @transform_1, window_bounds = array<i64: 4, 512>}, {transform_indices = @transform_2, window_bounds = array<i64: 4, 512>}]} {
    %c0 = arith.constant 0 : index
    %0 = memref.load %arg1[%c0] : memref<1xf32, #tpu.memory_space<smem>>
    %c0_0 = arith.constant 0 : index
    %c0_1 = arith.constant 0 : index
    %1 = vector.load %arg2[%c0_0, %c0_1] : memref<4x512xf32, #tpu.memory_space<vmem>>, vector<4x512xf32>
    %2 = vector.broadcast %0 : f32 to vector<4x512xf32>
    %3 = arith.mulf %2, %1 : vector<4x512xf32>
    %c0_2 = arith.constant 0 : index
    %c0_3 = arith.constant 0 : index
    %4 = vector.load %arg3[%c0_2, %c0_3] : memref<4x512xf32, #tpu.memory_space<vmem>>, vector<4x512xf32>
    tpu.vector_store %arg3[%c0_2, %c0_3], %3 {strides = array<i32>} : memref<4x512xf32, #tpu.memory_space<vmem>>, vector<4x512xf32>,
    return
  }
  func.func @transform_0(%arg0: i32) -> i32 {
    %c0_i32 = arith.constant 0 : i32
    %c0_i32_0 = arith.constant 0 : i32
    return %c0_i32 : i32
  }
  func.func @transform_1(%arg0: i32) -> (i32, i32) {
    %c0_i32 = arith.constant 0 : i32
    %c0_i32_0 = arith.constant 0 : i32
    return %arg0, %c0_i32 : i32, i32
  }
  func.func @transform_2(%arg0: i32) -> (i32, i32) {
    %c0_i32 = arith.constant 0 : i32
    %c0_i32_0 = arith.constant 0 : i32
    return %arg0, %c0_i32 : i32, i32
  }
}

</mosaic_0001>

<bundles_post_ra>
// kernel: tpu_custom_call.1
= control target key start
LH: loop header
LB: loop body
LE: loop exit
PB: predicated region body
PF: predicated region fallthrough
CT: control target
= control target key end

     0   :  { %8 = vsyncpa [#allocation4], 0  ;;  %s132_s0 = inlined_call_operand.<no memory space> [shape: f32[1], index: 0, kind: input, shape index: {}]   ;;  %s133_s1 = inlined_call_operand.hbm [shape: f32[4,512], index: 1, kind: input, shape index: {}]   ;;  %s134_s2 = inlined_call_operand.hbm [shape: f32[4,512], index: 2, kind: output, shape index: {}]  }
   0x1   :  { %9 = vsyncpa [#allocation5], 0  ;;  %s17_s11 = sshll.u32 %s133_s1, 4  ;;  %s106_s12 = smov [#allocation3]   ;;  %s18_s11 = int_to_ptr.hbm [resolvable:$true] %s17_s11 }
   0x2   :  { %s19_s13 = sshll.u32 %s106_s12, 4  ;;  %s20_s13 = int_to_ptr.vmem [resolvable:$true] %s19_s13 }
   0x3   :  { %22 = dma.hbm_to_vmem [thread:$0]  %s18_s11, 256, %s20_s13, [#allocation4]  }
   0x4   :  { %102 = dma.done.wait [#allocation4], 256  }
   0x5   :  { %103 = vsyncadd [#allocation4], 4294967040  ;;  %v30_v0 = vstv %s132_s0  ;;  %s107_s16 = smov [#allocation6]   ;;  %s42_s20 = sshll.u32 %s134_s2, 4  ;;  %v28_v1 = vld [vmem:[#allocation3] sm:$0xff]  ;;  %v29_v2 = vld [vmem:[#allocation3 + $0x8] sm:$0xff]  ;;  %s43_s20 = int_to_ptr.hbm [resolvable:$true] %s42_s20 }
   0x6   :  { %s40_s17 = sshll.u32 %s107_s16, 4  ;;  %v31_v3 = vmul.f32 %v30_v0, %v28_v1  ;;  %v32_v4 = vmul.f32 %v30_v0, %v29_v2  ;;  %s41_s17 = int_to_ptr.vmem [resolvable:$true] %s40_s17 }
   0x8   :  { %33 = vst [vmem:[#allocation6] sm:$0xff] %v31_v3 }
   0x9   :  { %34 = vst [vmem:[#allocation6 + $0x8] sm:$0xff] %v32_v4 }
   0xa   :  { %45 = dma.vmem_to_hbm [thread:$0]  %s41_s17, 256, %s43_s20, [#allocation5]  }
   0xb   :  { %104 = dma.done.wait [#allocation5], 256  }
   0xc   :  { %105 = vsyncadd [#allocation5], 4294967040 }
   0xd   :  { %50 = vsyncpa [#allocation4], 1 }
   0xe   :  { %51 = vsyncpa [#allocation5], 1 }

</bundles_post_ra>
